<compile_context>
chip_gen: v7x
topology: tpu7x:2x2x1
jax: 0.10.0
libtpu: 0.0.40
codegen_flags: <defaults>
</compile_context>

<pallas_src>
import functools

import jax
import jax.numpy as jnp
from jax.experimental import pallas as pl
from jax.experimental.pallas import tpu as pltpu


def _round_up(x, m):
    return (x + m - 1) // m * m


def _device_kind():
    try:
        return jax.devices()[0].device_kind.lower()
    except Exception:
        return ""


def _pad_dim(d, wide_mxu):
    # v6e/v7x MXUs are 256 wide; pad large dims to 256-multiples there, else 128.
    mult = 256 if (wide_mxu and d >= 128) else 128
    return _round_up(d, mult)


def _vmem_bytes(tb, kp, hp, op):
    """Rough VMEM footprint (the pipeline double-buffers every input)."""
    resident = 2 * (kp * hp * 2 + hp * 4 + hp * op * 2 + op * 4)   # weights/biases
    moving = 2 * (tb * 128 * 4) + 2 * (tb * op * 4)                # ids + out tiles
    temps = tb * kp * (2 + 4) + tb * hp * 4 + tb * op * 4          # one-hot/iota/h/y
    return resident + moving + temps


def mlp_kernel(ids_ref, w1e_ref, b1_ref, w2_ref, b2_ref, o_ref):
    """Fused gather (folded into fc1) -> bias -> ReLU -> fc2 for one batch tile."""
    cdt = w1e_ref.dtype                          # MXU operand dtype (bf16)
    tb = o_ref.shape[0]                          # batch tile
    kp = w1e_ref.shape[0]                        # padded 2*V contraction dim

    id0 = ids_ref[:, 0:1]                        # (tb, 1) token ids, part 0
    id1 = ids_ref[:, 1:2]                        # (tb, 1) token ids, part 1 (+V offset)
    iota = jax.lax.broadcasted_iota(jnp.int32, (tb, kp), 1)
    # Two-hot over the stacked [Wa; Wb] table: the two id ranges are disjoint
    # ([0,V) vs [V,2V)), so one OR-ed compare buffer feeds ONE MXU matmul.
    two_hot = ((id0 == iota) | (id1 == iota)).astype(cdt)          # (tb, Kp)

    # Embedding gather + feature concat + fc1 as a single contraction (f32 acc).
    h = jnp.dot(two_hot, w1e_ref[...], preferred_element_type=jnp.float32)
    h = jnp.maximum(h + b1_ref[...], 0.0)        # bias + ReLU on the VPU

    # fc2.
    y = jnp.dot(h.astype(cdt), w2_ref[...], preferred_element_type=jnp.float32)
    o_ref[...] = (y + b2_ref[...]).astype(o_ref.dtype)


@functools.partial(jax.jit, static_argnames=("block_b",))
def mlp_forward(x_tokens, emb_table, w1, b1, w2, b2, *, block_b=512):
    """x_tokens: (2, B) int32 token ids. Returns (B, output_dim) float32."""
    num_parts, B = x_tokens.shape
    assert num_parts == 2, "fc1 expects 2 * embedding_dim input features"
    V, E = emb_table.shape
    H = w1.shape[1]
    O = w2.shape[1]

    cdt = jnp.bfloat16                           # MXU operand dtype (f32 accumulation)
    kind = _device_kind()
    wide_mxu = ("v6" in kind) or ("v7" in kind)

    # Lane-dense padding of contraction / hidden / output dims (zero pad is inert).
    Kp = _pad_dim(2 * V, wide_mxu)
    Hp = _pad_dim(H, wide_mxu)
    Op = _pad_dim(O, wide_mxu)

    # Fold the embedding table into fc1: Wa = emb @ W1[:E], Wb = emb @ W1[E:]
    # (f32 accumulation, then a single bf16 rounding for the MXU operands).
    hi = jax.lax.Precision.HIGHEST
    emb32 = emb_table.astype(jnp.float32)
    w1f = w1.astype(jnp.float32)
    wa = jnp.dot(emb32, w1f[:E], precision=hi)                     # (V, H)
    wb = jnp.dot(emb32, w1f[E:], precision=hi)                     # (V, H)
    w1e = jnp.zeros((Kp, Hp), cdt)
    w1e = w1e.at[:V, :H].set(wa.astype(cdt)).at[V:2 * V, :H].set(wb.astype(cdt))

    b1p = jnp.pad(b1.reshape(1, -1).astype(jnp.float32), ((0, 0), (0, Hp - H)))
    w2p = jnp.pad(w2.astype(cdt), ((0, Hp - H), (0, Op - O)))      # (Hp, Op)
    b2p = jnp.pad(b2.reshape(1, -1).astype(jnp.float32), ((0, 0), (0, Op - O)))

    # Batch tiling: prefer >= 2 grid steps (v7x has 2 TensorCores), cap at block_b.
    b_pad8 = _round_up(B, 8)
    tb = min(block_b, max(8, _round_up(b_pad8 // 2, 8)))
    # Shrink the tile if the VMEM estimate exceeds the per-generation budget.
    vmem_cap = (56 if "v7" in kind else 100) * 1024 * 1024
    while tb > 8 and _vmem_bytes(tb, Kp, Hp, Op) > vmem_cap:
        tb = max(8, _round_up(tb // 2, 8))
    Bp = _round_up(B, tb)
    grid = (Bp // tb,)
    vmem_limit = int(min(vmem_cap,
                         max(32 * 1024 * 1024, 2 * _vmem_bytes(tb, Kp, Hp, Op))))

    # Single (Bp, 2) ids array; part-1 ids pre-offset by V into the Wb rows.
    # (Padded batch rows get id 0 -> throwaway rows, sliced off below.)
    ids = jnp.stack([x_tokens[0].astype(jnp.int32),
                     x_tokens[1].astype(jnp.int32) + V], axis=1)
    ids = jnp.pad(ids, ((0, Bp - B), (0, 0)))

    resident = lambda i: (0, 0)                  # weights pinned in VMEM across steps
    out = pl.pallas_call(
        mlp_kernel,
        out_shape=jax.ShapeDtypeStruct((Bp, Op), jnp.float32),
        grid_spec=pltpu.PrefetchScalarGridSpec(
            num_scalar_prefetch=0,
            grid=grid,
            in_specs=[
                pl.BlockSpec((tb, 2), lambda i: (i, 0)),   # ids tile (both parts)
                pl.BlockSpec((Kp, Hp), resident),          # folded [Wa; Wb] table
                pl.BlockSpec((1, Hp), resident),           # b1
                pl.BlockSpec((Hp, Op), resident),          # W2
                pl.BlockSpec((1, Op), resident),           # b2
            ],
            out_specs=pl.BlockSpec((tb, Op), lambda i: (i, 0)),
        ),
        compiler_params=pltpu.CompilerParams(
            dimension_semantics=("parallel",),             # megacore batch sharding
            vmem_limit_bytes=vmem_limit,
        ),
    )(ids, w1e, b1p, w2p, b2p)

    # TODO(synk): emit bf16 output if downstream consumers accept it (halves the
    #   lane-padded (tb, Op) writeback; most relevant on v5e's single vst slot).
    return out[:B, :O]


if __name__ == "__main__":
    # Small shapes consistent with the module.
    num_tokens = 16
    embedding_dim = 8
    hidden_dim = 32
    output_dim = 8
    batch = 8
    num_parts = 2

    key = jax.random.PRNGKey(0)
    k_emb, k_w1, k_b1, k_w2, k_b2, k_x = jax.random.split(key, 6)

    emb_table = jax.random.normal(k_emb, (num_tokens, embedding_dim), jnp.float32)
    w1 = jax.random.normal(k_w1, (2 * embedding_dim, hidden_dim), jnp.float32) * 0.1
    b1 = jax.random.normal(k_b1, (hidden_dim,), jnp.float32) * 0.1
    w2 = jax.random.normal(k_w2, (hidden_dim, output_dim), jnp.float32) * 0.1
    b2 = jax.random.normal(k_b2, (output_dim,), jnp.float32) * 0.1

    x_tokens = jax.random.randint(k_x, (num_parts, batch), 0, num_tokens, jnp.int32)

    out = mlp_forward(x_tokens, emb_table, w1, b1, w2, b2)
    out = jax.block_until_ready(out)
    assert out.shape == (batch, output_dim)

    # Reference 1: mirrors the kernel's folded bf16 numerics (f32 accumulation),
    # so the only remaining difference is MXU accumulation order.
    hi = jax.lax.Precision.HIGHEST
    wa_c = jnp.dot(emb_table, w1[:embedding_dim], precision=hi
                   ).astype(jnp.bfloat16).astype(jnp.float32)
    wb_c = jnp.dot(emb_table, w1[embedding_dim:], precision=hi
                   ).astype(jnp.bfloat16).astype(jnp.float32)
    h_ref = jnp.maximum(wa_c[x_tokens[0]] + wb_c[x_tokens[1]] + b1, 0.0)
    w2_c = w2.astype(jnp.bfloat16).astype(jnp.float32)
    ref_mirror = h_ref.astype(jnp.bfloat16).astype(jnp.float32) @ w2_c + b2
    assert jnp.allclose(out, ref_mirror, atol=2e-2, rtol=2e-2), (
        float(jnp.max(jnp.abs(out - ref_mirror))))

    # Reference 2: the original module forward in plain f32 (semantics check;
    # loose tolerance because of the intentional bf16 MXU operands).
    feats = jnp.concatenate(
        [jnp.take(emb_table, x_tokens[i], axis=0) for i in range(num_parts)],
        axis=1)
    ref_f32 = jnp.maximum(feats @ w1 + b1, 0.0) @ w2 + b2
    assert jnp.allclose(out, ref_f32, atol=1e-1, rtol=1e-1), (
        float(jnp.max(jnp.abs(out - ref_f32))))

    print("KERNEL_OK")
</pallas_src>

<mosaic_0001>
module attributes {stable_mosaic.version = 11 : i64} {
  func.func @mlp_kernel(%arg0: i32, %arg1: memref<8x2xi32, #tpu.memory_space<vmem>>, %arg2: memref<128x128xbf16, #tpu.memory_space<vmem>>, %arg3: memref<1x128xf32, #tpu.memory_space<vmem>>, %arg4: memref<128x128xbf16, #tpu.memory_space<vmem>>, %arg5: memref<1x128xf32, #tpu.memory_space<vmem>>, %arg6: memref<8x128xf32, #tpu.memory_space<vmem>>) attributes {dimension_semantics = [#tpu.dimension_semantics<parallel>], iteration_bounds = array<i64: 1>, scalar_prefetch = 0 : i64, scratch_operands = 0 : i64, tpu.core_type = #tpu.core_type<tc>, window_params = [{transform_indices = @transform_0, window_bounds = array<i64: 8, 2>}, {pipeline_mode = #tpu.pipeline_mode<synchronous>, transform_indices = @transform_1, window_bounds = array<i64: 128, 128>}, {pipeline_mode = #tpu.pipeline_mode<synchronous>, transform_indices = @transform_2, window_bounds = array<i64: 1, 128>}, {pipeline_mode = #tpu.pipeline_mode<synchronous>, transform_indices = @transform_3, window_bounds = array<i64: 128, 128>}, {pipeline_mode = #tpu.pipeline_mode<synchronous>, transform_indices = @transform_4, window_bounds = array<i64: 1, 128>}, {transform_indices = @transform_5, window_bounds = array<i64: 8, 128>}]} {
    %c0 = arith.constant 0 : index
    %c0_0 = arith.constant 0 : index
    %0 = vector.load %arg1[%c0, %c0_0] : memref<8x2xi32, #tpu.memory_space<vmem>>, vector<8x1xi32>
    %c0_1 = arith.constant 0 : index
    %c1 = arith.constant 1 : index
    %1 = vector.load %arg1[%c0_1, %c1] : memref<8x2xi32, #tpu.memory_space<vmem>>, vector<8x1xi32>
    %2 = tpu.iota {dimensions = array<i32: 1>} : vector<8x128xi32>
    %3 = vector.broadcast %0 : vector<8x1xi32> to vector<8x128xi32>
    %4 = arith.cmpi eq, %3, %2 : vector<8x128xi32>
    %5 = vector.broadcast %1 : vector<8x1xi32> to vector<8x128xi32>
    %6 = arith.cmpi eq, %5, %2 : vector<8x128xi32>
    %7 = arith.ori %4, %6 : vector<8x128xi1>
    %8 = arith.extui %7 : vector<8x128xi1> to vector<8x128xi32>
    %9 = arith.sitofp %8 : vector<8x128xi32> to vector<8x128xf32>
    %10 = arith.truncf %9 : vector<8x128xf32> to vector<8x128xbf16>
    %c0_2 = arith.constant 0 : index
    %c0_3 = arith.constant 0 : index
    %11 = vector.load %arg2[%c0_2, %c0_3] : memref<128x128xbf16, #tpu.memory_space<vmem>>, vector<128x128xbf16>
    %cst = arith.constant dense<0.000000e+00> : vector<8x128xf32>
    %12 = tpu.matmul %10, %11, %cst {dimension_numbers = #tpu.dot_dimension_numbers<[1], [0], [0], [1], [0, 0, 1, 1], [], []>} : vector<8x128xbf16>, vector<128x128xbf16>, vector<8x128xf32> -> vector<8x128xf32>
    %c0_4 = arith.constant 0 : index
    %c0_5 = arith.constant 0 : index
    %13 = vector.load %arg3[%c0_4, %c0_5] : memref<1x128xf32, #tpu.memory_space<vmem>>, vector<1x128xf32>
    %14 = vector.broadcast %13 : vector<1x128xf32> to vector<8x128xf32>
    %15 = arith.addf %12, %14 : vector<8x128xf32>
    %cst_6 = arith.constant 0.000000e+00 : f32
    %16 = vector.broadcast %cst_6 : f32 to vector<8x128xf32>
    %17 = arith.maximumf %15, %16 : vector<8x128xf32>
    %18 = arith.truncf %17 : vector<8x128xf32> to vector<8x128xbf16>
    %c0_7 = arith.constant 0 : index
    %c0_8 = arith.constant 0 : index
    %19 = vector.load %arg4[%c0_7, %c0_8] : memref<128x128xbf16, #tpu.memory_space<vmem>>, vector<128x128xbf16>
    %cst_9 = arith.constant dense<0.000000e+00> : vector<8x128xf32>
    %20 = tpu.matmul %18, %19, %cst_9 {dimension_numbers = #tpu.dot_dimension_numbers<[1], [0], [0], [1], [0, 0, 1, 1], [], []>} : vector<8x128xbf16>, vector<128x128xbf16>, vector<8x128xf32> -> vector<8x128xf32>
    %c0_10 = arith.constant 0 : index
    %c0_11 = arith.constant 0 : index
    %21 = vector.load %arg5[%c0_10, %c0_11] : memref<1x128xf32, #tpu.memory_space<vmem>>, vector<1x128xf32>
    %22 = vector.broadcast %21 : vector<1x128xf32> to vector<8x128xf32>
    %23 = arith.addf %20, %22 : vector<8x128xf32>
    %c0_12 = arith.constant 0 : index
    %c0_13 = arith.constant 0 : index
    %24 = vector.load %arg6[%c0_12, %c0_13] : memref<8x128xf32, #tpu.memory_space<vmem>>, vector<8x128xf32>
    tpu.vector_store %arg6[%c0_12, %c0_13], %23 {strides = array<i32>} : memref<8x128xf32, #tpu.memory_space<vmem>>, vector<8x128xf32>,
    return
  }
  func.func @transform_0(%arg0: i32) -> (i32, i32) {
    %c0_i32 = arith.constant 0 : i32
    %c0_i32_0 = arith.constant 0 : i32
    return %arg0, %c0_i32 : i32, i32
  }
  func.func @transform_1(%arg0: i32) -> (i32, i32) {
    %c0_i32 = arith.constant 0 : i32
    %c0_i32_0 = arith.constant 0 : i32
    %c0_i32_1 = arith.constant 0 : i32
    return %c0_i32, %c0_i32_0 : i32, i32
  }
  func.func @transform_2(%arg0: i32) -> (i32, i32) {
    %c0_i32 = arith.constant 0 : i32
    %c0_i32_0 = arith.constant 0 : i32
    %c0_i32_1 = arith.constant 0 : i32
    return %c0_i32, %c0_i32_0 : i32, i32
  }
  func.func @transform_3(%arg0: i32) -> (i32, i32) {
    %c0_i32 = arith.constant 0 : i32
    %c0_i32_0 = arith.constant 0 : i32
    %c0_i32_1 = arith.constant 0 : i32
    return %c0_i32, %c0_i32_0 : i32, i32
  }
  func.func @transform_4(%arg0: i32) -> (i32, i32) {
    %c0_i32 = arith.constant 0 : i32
    %c0_i32_0 = arith.constant 0 : i32
    %c0_i32_1 = arith.constant 0 : i32
    return %c0_i32, %c0_i32_0 : i32, i32
  }
  func.func @transform_5(%arg0: i32) -> (i32, i32) {
    %c0_i32 = arith.constant 0 : i32
    %c0_i32_0 = arith.constant 0 : i32
    return %arg0, %c0_i32 : i32, i32
  }
}

</mosaic_0001>

<bundles_post_ra>
// kernel: mlp_forward.1
= control target key start
LH: loop header
LB: loop body
LE: loop exit
PB: predicated region body
PF: predicated region fallthrough
CT: control target
= control target key end

     0   :  { %v403_v1 = vmov 0   ;;  %v404_v2 = vmov 0.0   ;;  %v405_v5 = vmov 1   ;;  %vm406_vm0 = vmmov 0   ;;  %s526_s0 = inlined_call_operand.vmem [shape: s32[8,2], index: 0, kind: input, shape index: {}]   ;;  %s527_s1 = inlined_call_operand.vmem [shape: bf16[128,128], index: 1, kind: input, shape index: {}]   ;;  %s528_s2 = inlined_call_operand.vmem [shape: f32[1,128], index: 2, kind: input, shape index: {}]   ;;  %s529_s3 = inlined_call_operand.vmem [shape: bf16[128,128], index: 3, kind: input, shape index: {}]   ;;  %s530_s4 = inlined_call_operand.vmem [shape: f32[1,128], index: 4, kind: input, shape index: {}]   ;;  %s531_s5 = inlined_call_operand.hbm [shape: f32[8,128], index: 5, kind: output, shape index: {}]  }
   0x1   :  { %v22_v0 = vld [vmem:[%s526_s0] sm:$0xff]  ;;  %361 = vset.pattern.permute.xlu0 %v403_v1  ;;  %315 = vmatprep.subr.bf16.mxu0 %v404_v2  ;;  %v364_v4 = vld [vmem:[%s527_s1 + $0x8] sm:$0xff]   ;;  %v365_v6 = vld [vmem:[%s527_s1 + $0x10] sm:$0xff]  }
   0x2   :  { %v363_v3 = vld [vmem:[%s527_s1] sm:$0xff]   ;;  %26 = vperm.xlu0 %361, %v22_v0   ;;  %335 = vmatprep.subr.bf16.mxu1 %v404_v2  ;;  %v366_v8 = vld [vmem:[%s527_s1 + $0x18] sm:$0xff]   ;;  %v372_v9 = vld [vmem:[%s529_s3 + $0x8] sm:$0xff]  }
   0x3   :  { %316 = vmatpush3.bf16.msra.mxu0 %v363_v3  ;;  %331 = vmatprep.mubr.msk.bf16.mxu0 %vm406_vm0, %v404_v2  ;;  %v371_v7 = vld [vmem:[%s529_s3] sm:$0xff]   ;;  %v373_v11 = vld [vmem:[%s529_s3 + $0x10] sm:$0xff]  }
   0x4   :  { %317 = vmatprep.subr.bf16.mxu0 %v404_v2  ;;  %351 = vmatprep.mubr.msk.bf16.mxu1 %vm406_vm0, %v404_v2  ;;  %v367_v10 = vld [vmem:[%s527_s1 + $0x20] sm:$0xff]  }
   0x5   :  { %336 = vmatpush3.bf16.msra.mxu1 %v371_v7 }
   0x6   :  { %362 = vset.pattern.permute.xlu0 %v405_v5  ;;  %337 = vmatprep.subr.bf16.mxu1 %v404_v2 }
   0x7   :  { %30 = vperm.xlu0 %362, %v22_v0   ;;  %318 = vmatpush3.bf16.msra.mxu0 %v364_v4 }
   0x8   :  { %319 = vmatprep.subr.bf16.mxu0 %v404_v2 }
   0x9   :  { %338 = vmatpush3.bf16.msra.mxu1 %v372_v9 }
   0xb   :  { %320 = vmatpush3.bf16.msra.mxu0 %v365_v6 }
   0xc   :  { %321 = vmatprep.subr.bf16.mxu0 %v404_v2 }
   0xf   :  { %322 = vmatpush3.bf16.msra.mxu0 %v366_v8 }
  0x10   :  { %323 = vmatprep.subr.bf16.mxu0 %v404_v2 }
  0x11   :  { %10 = vsyncpa [#allocation3], 0  ;;  %339 = vmatprep.subr.bf16.mxu1 %v404_v2  ;;  %v368_v12 = vld [vmem:[%s527_s1 + $0x28] sm:$0xff]   ;;  %v374_v13 = vld [vmem:[%s529_s3 + $0x18] sm:$0xff]   ;;  %v23_v18 = vlaneseq  ;;  %v407_v22 = vmov 1.0|1.0  }
  0x12   :  { %340 = vmatpush3.bf16.msra.mxu1 %v373_v11  ;;  %v369_v14 = vld [vmem:[%s527_s1 + $0x30] sm:$0xff]   ;;  %v375_v15 = vld [vmem:[%s529_s3 + $0x20] sm:$0xff]   ;;  %v370_v16 = vld [vmem:[%s527_s1 + $0x38] sm:$0xff]   ;;  %s408_s28 = smov [#allocation2]  }
  0x13   :  { %324 = vmatpush3.bf16.msra.mxu0 %v367_v10  ;;  %341 = vmatprep.subr.bf16.mxu1 %v404_v2  ;;  %v376_v17 = vld [vmem:[%s529_s3 + $0x28] sm:$0xff]   ;;  %v24_v20 = vand.u32 127, %v23_v18  ;;  %v377_v23 = vld [vmem:[%s529_s3 + $0x30] sm:$0xff]   ;;  %v378_v24 = vld [vmem:[%s529_s3 + $0x38] sm:$0xff]   ;;  %s268_s29 = sshll.u32 %s408_s28, 4  ;;  %s269_s29 = int_to_ptr.vmem [resolvable:$true] %s268_s29 }
  0x14   :  { %325 = vmatprep.subr.bf16.mxu0 %v404_v2  ;;  %v277_v25 = vld [vmem:[%s528_s2] ss:$0 sm:$0xff]  ;;  %s379_s2 = scalar_lea.vmem %s269_s29, 128  ;;  %p384_p1 = scmp.lt.s32.totalorder %s269_s29, %s269_s29 }
  0x15   :  { %v288_v33 = vld [vmem:[%s530_s4] ss:$0 sm:$0xff]  ;;  %p380_p0 = scmp.ne.s32.totalorder %s269_s29, %s379_s2  ;;  %p385_p2 = scmp.lt.s32.totalorder %s379_s2, %s379_s2 }
  0x16   :  { %342 = vmatpush3.bf16.msra.mxu1 %v374_v13 }
  0x17   :  { %326 = vmatpush3.bf16.msra.mxu0 %v368_v12  ;;  %343 = vmatprep.subr.bf16.mxu1 %v404_v2  ;;  %p386_p3 = por %p385_p2, %p384_p1 }
  0x18   :  { %327 = vmatprep.subr.bf16.mxu0 %v404_v2 }
  0x19   :  { %p387_p4 = pnand %p386_p3, %p380_p0 }
  0x1a   :  { %344 = vmatpush3.bf16.msra.mxu1 %v375_v15 }
  0x1b   :  { %328 = vmatpush3.bf16.msra.mxu0 %v369_v14  ;;  %345 = vmatprep.subr.bf16.mxu1 %v404_v2 }
  0x1c   :  { %329 = vmatprep.subr.bf16.mxu0 %v404_v2 }
  0x1e   :  { %346 = vmatpush3.bf16.msra.mxu1 %v376_v17 }
  0x1f   :  { %330 = vmatpush3.bf16.msra.mxu0 %v370_v16  ;;  %347 = vmatprep.subr.bf16.mxu1 %v404_v2 }
  0x22   :  { %348 = vmatpush3.bf16.msra.mxu1 %v377_v23 }
  0x23   :  { %349 = vmatprep.subr.bf16.mxu1 %v404_v2 }
  0x26   :  { %350 = vmatpush3.bf16.msra.mxu1 %v378_v24 }
  0x81   :  { %v27_v19 = vpop.permute.xlu0 %26 }
  0x82   :  { %vm28_vm1 = vcmp.eq.s32.totalorder %v27_v19, %v24_v20 }
  0x86   :  { %v31_v21 = vpop.permute.xlu0 %30 }
  0x87   :  { %vm32_vm2 = vcmp.eq.s32.totalorder %v31_v21, %v24_v20 }
  0x88   :  { %vm33_vm3 = vmor %vm28_vm1, %vm32_vm2 }
  0x89   :  { %vm286_vm4 = vmpackc.low %vm33_vm3, %vm33_vm3 }
  0x8a   :  { %332 = vmatmul.mubr.msk.bf16.vlgmr.msra.gmra.mrb[0].mxu0 %vm286_vm4, %v407_v22 }
 0x15d   :  { %v142_v26 = vpop.f32.mrb[0].mxu0 }
 0x15e   :  { %v143_v27 = vadd.f32 %v277_v25, %v142_v26  ;;  %v333_v28 = vpop.f32.mrb[1].mxu0 }
 0x15f   :  { %v145_v29 = vpop.f32.mrb[2].mxu0 }
 0x160   :  { %v148_v30 = vmax.f32 %v143_v27, 0.0  ;;  %v334_v31 = vpop.f32.mrb[3].mxu0 }
 0x162   :  { %v149_v32 = vpack.c.bf16 %v148_v30, %v148_v30 }
 0x164   :  { %352 = vmatmul.mubr.bf16.vlgmr.msra.gmra.mrb[0].mxu1 %v149_v32 }
 0x237   :  { %v255_v34 = vpop.f32.mrb[0].mxu1 }
 0x238   :  { %v256_v35 = vadd.f32 %v288_v33, %v255_v34  ;;  %v353_v36 = vpop.f32.mrb[1].mxu1 }
 0x239   :  { %v258_v37 = vpop.f32.mrb[2].mxu1 }
 0x23a   :  { %261 = vst [vmem:[#allocation2] sm:$0xff] %v256_v35  ;;  %v354_v38 = vpop.f32.mrb[3].mxu1 }
 0x23b   :  { %390 = shalt.err (!%p387_p4)
}
 0x23c   :  { %s391_s4 = scalar_lea.hbm %s531_s5, 128 }
 0x23d   :  { %p392_p5 = scmp.ne.s32.totalorder %s531_s5, %s391_s4  ;;  %p395_p6 = scmp.lt.u32.totalorder %s391_s4, %s531_s5 }
 0x23f   :  { %p397_p7 = pnand %p395_p6, %p392_p5 }
 0x241   :  { %400 = shalt.err (!%p397_p7)
}
 0x242   :  { %271 = dma.vmem_to_hbm [thread:$0]  %s269_s29, 128, %s531_s5, [#allocation3]  }
 0x243   :  { %401 = dma.done.wait [#allocation3], 128  }
 0x244   :  { %402 = vsyncadd [#allocation3], 4294967168 }
 0x245   :  { %275 = vsyncpa [#allocation3], 1 }

</bundles_post_ra>
